<compile_context>
chip_gen: v5e
topology: v5e:2x2
jax: 0.10.0
libtpu: 0.0.40
codegen_flags: <defaults>
</compile_context>

<pallas_src>
import functools

import jax
import jax.numpy as jnp
from jax import lax
from jax.experimental import pallas as pl
from jax.experimental.pallas import tpu as pltpu

POOL = 2        # maxout pool size
Z_ORDER = 2     # model order of z
BN_EPS = 1e-5
MAX_TILE = 8192                 # batch-tile (lane) width; multiple of 128
VMEM_LIMIT = 32 * 1024 * 1024


def _round_up(x, m):
    return (x + m - 1) // m * m


# ---------------------------------------------------------------------------
# Pass 1: fused MLP (Linear -> Maxout -> Linear) + per-tile BN partial stats.
# Everything is lane-major: [features, TB].
# ---------------------------------------------------------------------------
def _mlp_stats_kernel(x_ref, w1_ref, b1_ref, w2_ref, b2_ref,
                      h2_ref, stats_ref, *, valid_cols):
    x = x_ref[0]                                            # [d0, TB]
    d1 = w2_ref.shape[1]

    # Layer 0: fused [2*d1, d0] weight (even/odd maxout halves stacked along
    # rows in the wrapper) -> one MXU matmul; maxout == row-half max.
    y = lax.dot_general(w1_ref[...], x, (((1,), (0,)), ((), ())),
                        preferred_element_type=jnp.float32) + b1_ref[...]
    h1 = jnp.maximum(y[:d1, :], y[d1:, :])                  # [d1, TB]

    # Last layer (keep pre-bias value around for shifted BN statistics).
    h2nb = lax.dot_general(w2_ref[...], h1, (((1,), (0,)), ((), ())),
                           preferred_element_type=jnp.float32)   # [d2, TB]
    h2_ref[0] = h2nb + b2_ref[...]

    # BN partial stats for this tile (padded batch columns masked out).  Lane
    # reduction is done on the MXU by contracting the lane dim of both
    # operands -> result is already a lane-major [1, 2*d2] row.
    tb = x.shape[1]
    col = pl.program_id(1) * tb + lax.broadcasted_iota(jnp.int32, h2nb.shape, 1)
    h2m = jnp.where(col < valid_cols, h2nb, 0.0)
    stacked = jnp.concatenate([h2m, h2m * h2m], axis=0)     # [2*d2, TB]
    ones = jnp.ones((1, tb), jnp.float32)
    srow = lax.dot_general(ones, stacked, (((1,), (1,)), ((), ())),
                           preferred_element_type=jnp.float32)   # [1, 2*d2]
    stats_ref[...] = srow.reshape(stats_ref.shape)


# ---------------------------------------------------------------------------
# Pass 2: folded BatchNorm (scale/shift) + phi/z maxout logits; lane-major.
# ---------------------------------------------------------------------------
def _bn_logit_kernel(h2_ref, p_ref, bconst_ref, h_ref, logits_ref):
    h2a = h2_ref[0]                                         # [d2, TB]
    h2b = h2_ref[1]

    def col(k):
        return p_ref[:, k:k + 1]                            # [d2, 1] per-feature

    scale, shift = col(16), col(17)                         # gamma*inv, beta-scale*mean
    ha = scale * h2a + shift
    hb = scale * h2b + shift
    h_ref[0] = ha
    h_ref[1] = hb

    # phi (maxout) term.
    da = ha - col(4)
    db = hb - col(5)
    ha_mo = jnp.maximum(col(0) * da, col(1) * da)
    hb_mo = jnp.maximum(col(2) * db, col(3) * db)

    # z term.
    za = jnp.maximum(col(6) * (ha - col(10)), col(7) * (ha - col(11)))
    zbm = jnp.maximum(col(8) * (hb - col(12)), col(9) * (hb - col(13)))

    # Per-feature logit contribution, reduced over the d2 sublanes (cheap,
    # off critical path) -> dense [1, TB] logits row.
    m = col(14) * za * za + col(15) * zbm * zbm - ha_mo * hb_mo
    lrow = jnp.sum(m, axis=0, keepdims=True) + bconst_ref[0]
    logits_ref[...] = lrow


# ---------------------------------------------------------------------------
# Wrapper
# ---------------------------------------------------------------------------
@functools.partial(jax.jit, static_argnames=("max_tile",))
def net_forward(x, params, *, max_tile=MAX_TILE):
    """x: [batch, node=2, dim_in]; returns (logits [batch], h [batch, 2, num_dim])."""
    w1, b1, w2, b2, gamma, beta, phiw, phib, zw, zw2, zb, bconst = params
    batch, num_node, d0 = x.shape
    assert num_node == 2, "this kernel implements the num_node == 2 forward path"
    d2, d1 = w2.shape
    assert w1.shape[0] == d1 * POOL

    # ---- batch tiling: batch is the lane axis, tiles are multiples of 128 ----
    tile_cap = max(128, _round_up(min(max_tile, max(batch, 1)), 128))
    nt = -(-batch // tile_cap)                  # tiles per node
    tb = _round_up(-(-batch // nt), 128)        # balanced tile width
    b_pad = nt * tb

    # ---- layout plumbing: batch-on-lanes transpose of the (small) input ----
    xT = jnp.transpose(x.astype(jnp.float32), (1, 2, 0))     # [2, d0, batch]
    if b_pad != batch:
        xT = jnp.pad(xT, ((0, 0), (0, 0), (0, b_pad - batch)))

    # Fused layer-0 weight: even/odd maxout halves stacked along output rows.
    w1c = jnp.concatenate([w1[0::2, :], w1[1::2, :]], axis=0).astype(jnp.float32)
    b1c = jnp.concatenate([b1[0::2], b1[1::2]])[:, None].astype(jnp.float32)
    w2f = w2.astype(jnp.float32)
    b2c = b2[:, None].astype(jnp.float32)

    # ---- pass 1: fused MLP + per-tile BN partial stats ----
    flops1 = 2 * (2 * b_pad) * (d0 * (2 * d1) + d1 * d2 + 2 * d2)
    bytes1 = 4 * (2 * b_pad * (d0 + d2) + (2 * d1) * (d0 + 1)
                  + d2 * (d1 + 1) + 2 * nt * 2 * d2)
    h2T, stats = pl.pallas_call(
        functools.partial(_mlp_stats_kernel, valid_cols=batch),
        grid=(2, nt),
        in_specs=[
            pl.BlockSpec((1, d0, tb), lambda n, i: (n, 0, i)),
            pl.BlockSpec((2 * d1, d0), lambda n, i: (0, 0)),
            pl.BlockSpec((2 * d1, 1), lambda n, i: (0, 0)),
            pl.BlockSpec((d2, d1), lambda n, i: (0, 0)),
            pl.BlockSpec((d2, 1), lambda n, i: (0, 0)),
        ],
        out_specs=(
            pl.BlockSpec((1, d2, tb), lambda n, i: (n, 0, i)),
            pl.BlockSpec((1, 1, 1, 2 * d2), lambda n, i: (n, i, 0, 0)),
        ),
        out_shape=(
            jax.ShapeDtypeStruct((2, d2, b_pad), jnp.float32),
            jax.ShapeDtypeStruct((2, nt, 1, 2 * d2), jnp.float32),
        ),
        compiler_params=pltpu.CompilerParams(
            dimension_semantics=("parallel", "parallel"),
            vmem_limit_bytes=VMEM_LIMIT),
        cost_estimate=pl.CostEstimate(
            flops=flops1, transcendentals=0, bytes_accessed=bytes1),
    )(xT, w1c, b1c, w2f, b2c)

    # ---- BN statistics finalize (tiny [d2] work; train-mode semantics) ----
    parts = stats.reshape(-1, 2, d2)
    n = 2.0 * batch
    mean_nb = jnp.sum(parts[:, 0, :], axis=0) / n
    var = jnp.maximum(jnp.sum(parts[:, 1, :], axis=0) / n - mean_nb * mean_nb, 0.0)
    mean = mean_nb + b2.astype(jnp.float32)          # re-add the b2 shift
    inv = lax.rsqrt(var + BN_EPS)
    scale = gamma.astype(jnp.float32) * inv
    shift = beta.astype(jnp.float32) - scale * mean

    # Per-feature parameter slab for pass 2 (features on sublanes): [d2, 18].
    pstack = jnp.stack([
        phiw[:, 0, 0], phiw[:, 0, 1], phiw[:, 1, 0], phiw[:, 1, 1],
        phib[:, 0], phib[:, 1],
        zw[:, 0, 0], zw[:, 0, 1], zw[:, 1, 0], zw[:, 1, 1],
        zb[:, 0, 0], zb[:, 0, 1], zb[:, 1, 0], zb[:, 1, 1],
        zw2[:, 0], zw2[:, 1],
        scale, shift,
    ], axis=1).astype(jnp.float32)
    bconst1 = jnp.reshape(bconst, (1,)).astype(jnp.float32)

    # ---- pass 2: BN normalize + phi/z logits ----
    flops2 = 30 * (2 * b_pad) * d2
    bytes2 = 4 * (4 * b_pad * d2 + 18 * d2 + 1 + b_pad)
    hT, logits_rows = pl.pallas_call(
        _bn_logit_kernel,
        grid=(nt,),
        in_specs=[
            pl.BlockSpec((2, d2, tb), lambda i: (0, 0, i)),
            pl.BlockSpec((d2, 18), lambda i: (0, 0)),
            pl.BlockSpec(memory_space=pltpu.MemorySpace.SMEM),
        ],
        out_specs=(
            pl.BlockSpec((2, d2, tb), lambda i: (0, 0, i)),
            pl.BlockSpec((1, tb), lambda i: (0, i)),
        ),
        out_shape=(
            jax.ShapeDtypeStruct((2, d2, b_pad), jnp.float32),
            jax.ShapeDtypeStruct((1, b_pad), jnp.float32),
        ),
        compiler_params=pltpu.CompilerParams(
            dimension_semantics=("parallel",), vmem_limit_bytes=VMEM_LIMIT),
        cost_estimate=pl.CostEstimate(
            flops=flops2, transcendentals=0, bytes_accessed=bytes2),
    )(h2T, pstack, bconst1)

    logits = logits_rows[0, :batch]
    h = jnp.transpose(hT, (2, 0, 1))[:batch]       # [batch, 2, d2] final layout
    return logits, h


# ---------------------------------------------------------------------------
# Parameters + pure-JAX reference (mirror of the PyTorch forward).
# ---------------------------------------------------------------------------
def init_params(key, h_sizes):
    """Deterministic synthetic parameters; shapes follow Net.__init__."""
    d0, d1, d2 = h_sizes[0], h_sizes[1], h_sizes[2]
    ks = jax.random.split(key, 12)

    def xavier(k, shape):
        fan_out, fan_in = shape
        bound = (6.0 / (fan_in + fan_out)) ** 0.5
        return jax.random.uniform(k, shape, jnp.float32, -bound, bound)

    w1 = xavier(ks[0], (d1 * POOL, d0))
    b1 = jax.random.uniform(ks[1], (d1 * POOL,), jnp.float32,
                            -1.0 / d0 ** 0.5, 1.0 / d0 ** 0.5)
    w2 = xavier(ks[2], (d2, d1))
    b2 = jax.random.uniform(ks[3], (d2,), jnp.float32,
                            -1.0 / d1 ** 0.5, 1.0 / d1 ** 0.5)
    gamma = 1.0 + 0.1 * jax.random.normal(ks[4], (d2,), jnp.float32)
    beta = 0.1 * jax.random.normal(ks[5], (d2,), jnp.float32)
    phiw = 1.0 + 0.1 * jax.random.normal(ks[6], (d2, 2, 2), jnp.float32)
    phib = 0.1 * jax.random.normal(ks[7], (d2, 2), jnp.float32)
    zw = 1.0 + 0.1 * jax.random.normal(ks[8], (d2, Z_ORDER, 2), jnp.float32)
    zw2 = 0.1 * jax.random.normal(ks[9], (d2, 2), jnp.float32)
    zb = 0.1 * jax.random.normal(ks[10], (d2, Z_ORDER, 2), jnp.float32)
    bconst = 0.1 * jax.random.normal(ks[11], (1,), jnp.float32)
    return (w1, b1, w2, b2, gamma, beta, phiw, phib, zw, zw2, zb, bconst)


def reference_forward(x, params):
    """Pure-JAX mirror of the PyTorch forward (calc_logit=True, train-mode BN)."""
    w1, b1, w2, b2, gamma, beta, phiw, phib, zw, zw2, zb, bconst = params
    h = jnp.einsum('bnd,od->bno', x, w1) + b1
    B, node, dp = h.shape
    h = jnp.max(h.reshape(B, node, dp // POOL, POOL), axis=-1)
    h = jnp.einsum('bnd,od->bno', h, w2) + b2
    hf = h.reshape(-1, h.shape[-1])
    mean = jnp.mean(hf, axis=0)
    var = jnp.mean((hf - mean) ** 2, axis=0)
    hf = gamma * (hf - mean) / jnp.sqrt(var + BN_EPS) + beta
    h = hf.reshape(h.shape)
    ha_mo = jnp.max(phiw[None, :, 0, :] * (h[:, 0, :, None] - phib[None, :, 0, None]), axis=-1)
    hb_mo = jnp.max(phiw[None, :, 1, :] * (h[:, 1, :, None] - phib[None, :, 1, None]), axis=-1)
    logits = jnp.sum(hb_mo * ha_mo, axis=1)
    za = jnp.max(zw[None, :, 0, :] * (h[:, 0, :, None] - zb[None, :, 0, :]), axis=-1)
    zbv = jnp.max(zw[None, :, 1, :] * (h[:, 1, :, None] - zb[None, :, 1, :]), axis=-1)
    logitsz = (jnp.sum(zw2[:, 0][None, :] * za ** 2, axis=-1)
               + jnp.sum(zw2[:, 1][None, :] * zbv ** 2, axis=-1))
    logits = -logits + logitsz + bconst
    return logits, h


if __name__ == "__main__":
    key = jax.random.PRNGKey(0)
    kx, kp = jax.random.split(key)

    # h_sizes = [input_dim, hidden_dim, num_dim]; num_node = 2.
    h_sizes = [12, 16, 8]
    params = init_params(kp, h_sizes)

    # Case 1: tiny batch (single 128-lane tile; exercises heavy batch padding).
    batch, num_node = 8, 2
    x = jax.random.normal(kx, (batch, num_node, h_sizes[0]), jnp.float32)
    logits, h = net_forward(x, params)
    jax.block_until_ready((logits, h))
    ref_logits, ref_h = reference_forward(x, params)
    assert h.shape == (batch, num_node, h_sizes[-1])
    assert logits.shape == (batch,)
    assert jnp.allclose(h, ref_h, rtol=2e-2, atol=2e-2), "h mismatch vs reference"
    assert jnp.allclose(logits, ref_logits, rtol=2e-2, atol=2e-2), "logits mismatch vs reference"

    # Case 2: batch not a multiple of the 128-lane tile; multi-tile grid
    # (max_tile=128 forces 3 batch tiles per node + padding mask).
    batch2 = 300
    x_case2 = jax.random.normal(jax.random.PRNGKey(3),
                                (batch2, num_node, h_sizes[0]), jnp.float32)
    logits2, h2 = net_forward(x_case2, params, max_tile=128)
    jax.block_until_ready((logits2, h2))
    ref_logits2, ref_h2 = reference_forward(x_case2, params)
    assert jnp.allclose(h2, ref_h2, rtol=2e-2, atol=2e-2), "h mismatch (tiled)"
    assert jnp.allclose(logits2, ref_logits2, rtol=2e-2, atol=2e-2), "logits mismatch (tiled)"

    print("KERNEL_OK")
</pallas_src>

<mosaic_0001>
module attributes {stable_mosaic.version = 11 : i64} {
  func.func @_mlp_stats_kernel(%arg0: i32, %arg1: i32, %arg2: memref<1x12x128xf32, #tpu.memory_space<vmem>>, %arg3: memref<32x12xf32, #tpu.memory_space<vmem>>, %arg4: memref<32x1xf32, #tpu.memory_space<vmem>>, %arg5: memref<8x16xf32, #tpu.memory_space<vmem>>, %arg6: memref<8x1xf32, #tpu.memory_space<vmem>>, %arg7: memref<1x8x128xf32, #tpu.memory_space<vmem>>, %arg8: memref<1x1x1x16xf32, #tpu.memory_space<vmem>>) attributes {dimension_semantics = [#tpu.dimension_semantics<parallel>, #tpu.dimension_semantics<parallel>], iteration_bounds = array<i64: 2, 1>, scalar_prefetch = 0 : i64, scratch_operands = 0 : i64, tpu.core_type = #tpu.core_type<tc>, window_params = [{transform_indices = @transform_0, window_bounds = array<i64: 1, 12, 128>}, {pipeline_mode = #tpu.pipeline_mode<synchronous>, transform_indices = @transform_1, window_bounds = array<i64: 32, 12>}, {pipeline_mode = #tpu.pipeline_mode<synchronous>, transform_indices = @transform_2, window_bounds = array<i64: 32, 1>}, {pipeline_mode = #tpu.pipeline_mode<synchronous>, transform_indices = @transform_3, window_bounds = array<i64: 8, 16>}, {pipeline_mode = #tpu.pipeline_mode<synchronous>, transform_indices = @transform_4, window_bounds = array<i64: 8, 1>}, {transform_indices = @transform_5, window_bounds = array<i64: 1, 8, 128>}, {transform_indices = @transform_6, window_bounds = array<i64: 1, 1, 1, 16>}]} {
    %c0 = arith.constant 0 : index
    %c0_0 = arith.constant 0 : index
    %c0_1 = arith.constant 0 : index
    %0 = vector.load %arg2[%c0, %c0_0, %c0_1] : memref<1x12x128xf32, #tpu.memory_space<vmem>>, vector<1x12x128xf32>
    %1 = vector.shape_cast %0 : vector<1x12x128xf32> to vector<12x128xf32>
    %c0_2 = arith.constant 0 : index
    %c0_3 = arith.constant 0 : index
    %2 = vector.load %arg3[%c0_2, %c0_3] : memref<32x12xf32, #tpu.memory_space<vmem>>, vector<32x12xf32>
    %cst = arith.constant dense<0.000000e+00> : vector<32x128xf32>
    %3 = tpu.matmul %2, %1, %cst {dimension_numbers = #tpu.dot_dimension_numbers<[1], [0], [0], [1], [0, 0, 1, 1], [], []>} : vector<32x12xf32>, vector<12x128xf32>, vector<32x128xf32> -> vector<32x128xf32>
    %c0_4 = arith.constant 0 : index
    %c0_5 = arith.constant 0 : index
    %4 = vector.load %arg4[%c0_4, %c0_5] : memref<32x1xf32, #tpu.memory_space<vmem>>, vector<32x1xf32>
    %5 = vector.broadcast %4 : vector<32x1xf32> to vector<32x128xf32>
    %6 = arith.addf %3, %5 : vector<32x128xf32>
    %7 = vector.extract_strided_slice %6 {offsets = [0, 0], sizes = [16, 128], strides = [1, 1]} : vector<32x128xf32> to vector<16x128xf32>
    %8 = vector.extract_strided_slice %6 {offsets = [16, 0], sizes = [16, 128], strides = [1, 1]} : vector<32x128xf32> to vector<16x128xf32>
    %9 = arith.maximumf %7, %8 : vector<16x128xf32>
    %c0_6 = arith.constant 0 : index
    %c0_7 = arith.constant 0 : index
    %10 = vector.load %arg5[%c0_6, %c0_7] : memref<8x16xf32, #tpu.memory_space<vmem>>, vector<8x16xf32>
    %cst_8 = arith.constant dense<0.000000e+00> : vector<8x128xf32>
    %11 = tpu.matmul %10, %9, %cst_8 {dimension_numbers = #tpu.dot_dimension_numbers<[1], [0], [0], [1], [0, 0, 1, 1], [], []>} : vector<8x16xf32>, vector<16x128xf32>, vector<8x128xf32> -> vector<8x128xf32>
    %c0_9 = arith.constant 0 : index
    %c0_10 = arith.constant 0 : index
    %12 = vector.load %arg6[%c0_9, %c0_10] : memref<8x1xf32, #tpu.memory_space<vmem>>, vector<8x1xf32>
    %13 = vector.broadcast %12 : vector<8x1xf32> to vector<8x128xf32>
    %14 = arith.addf %11, %13 : vector<8x128xf32>
    %c0_11 = arith.constant 0 : index
    %c0_12 = arith.constant 0 : index
    %c0_13 = arith.constant 0 : index
    %15 = vector.load %arg7[%c0_11, %c0_12, %c0_13] : memref<1x8x128xf32, #tpu.memory_space<vmem>>, vector<1x8x128xf32>
    %16 = vector.shape_cast %15 : vector<1x8x128xf32> to vector<8x128xf32>
    %17 = vector.shape_cast %14 : vector<8x128xf32> to vector<1x8x128xf32>
    tpu.vector_store %arg7[%c0_11, %c0_12, %c0_13], %17 {strides = array<i32>} : memref<1x8x128xf32, #tpu.memory_space<vmem>>, vector<1x8x128xf32>,
    %c128_i32 = arith.constant 128 : i32
    %18 = arith.muli %arg1, %c128_i32 : i32
    %19 = tpu.iota {dimensions = array<i32: 1>} : vector<8x128xi32>
    %20 = vector.broadcast %18 : i32 to vector<8x128xi32>
    %21 = arith.addi %20, %19 : vector<8x128xi32>
    %c8_i32 = arith.constant 8 : i32
    %22 = vector.broadcast %c8_i32 : i32 to vector<8x128xi32>
    %23 = arith.cmpi slt, %21, %22 : vector<8x128xi32>
    %cst_14 = arith.constant 0.000000e+00 : f32
    %24 = vector.broadcast %cst_14 : f32 to vector<8x128xf32>
    %25 = arith.select %23, %11, %24 : vector<8x128xi1>, vector<8x128xf32>
    %26 = arith.mulf %25, %25 : vector<8x128xf32>
    %27 = tpu.concatenate %25, %26 in 0 : vector<8x128xf32>, vector<8x128xf32> -> vector<16x128xf32>
    %cst_15 = arith.constant 1.000000e+00 : f32
    %28 = vector.broadcast %cst_15 : f32 to vector<1x128xf32>
    %cst_16 = arith.constant dense<0.000000e+00> : vector<1x16xf32>
    %29 = tpu.matmul %28, %27, %cst_16 {dimension_numbers = #tpu.dot_dimension_numbers<[1], [1], [0], [0], [0, 0, 1, 0], [], []>} : vector<1x128xf32>, vector<16x128xf32>, vector<1x16xf32> -> vector<1x16xf32>
    %30 = vector.shape_cast %29 : vector<1x16xf32> to vector<1x1x1x16xf32>
    %c0_17 = arith.constant 0 : index
    %c0_18 = arith.constant 0 : index
    %c0_19 = arith.constant 0 : index
    %c0_20 = arith.constant 0 : index
    %31 = vector.load %arg8[%c0_17, %c0_18, %c0_19, %c0_20] : memref<1x1x1x16xf32, #tpu.memory_space<vmem>>, vector<1x1x1x16xf32>
    tpu.vector_store %arg8[%c0_17, %c0_18, %c0_19, %c0_20], %30 {strides = array<i32>} : memref<1x1x1x16xf32, #tpu.memory_space<vmem>>, vector<1x1x1x16xf32>,
    return
  }
  func.func @transform_0(%arg0: i32, %arg1: i32) -> (i32, i32, i32) {
    %c0_i32 = arith.constant 0 : i32
    %c0_i32_0 = arith.constant 0 : i32
    return %arg0, %c0_i32, %arg1 : i32, i32, i32
  }
  func.func @transform_1(%arg0: i32, %arg1: i32) -> (i32, i32) {
    %c0_i32 = arith.constant 0 : i32
    %c0_i32_0 = arith.constant 0 : i32
    %c0_i32_1 = arith.constant 0 : i32
    return %c0_i32, %c0_i32_0 : i32, i32
  }
  func.func @transform_2(%arg0: i32, %arg1: i32) -> (i32, i32) {
    %c0_i32 = arith.constant 0 : i32
    %c0_i32_0 = arith.constant 0 : i32
    %c0_i32_1 = arith.constant 0 : i32
    return %c0_i32, %c0_i32_0 : i32, i32
  }
  func.func @transform_3(%arg0: i32, %arg1: i32) -> (i32, i32) {
    %c0_i32 = arith.constant 0 : i32
    %c0_i32_0 = arith.constant 0 : i32
    %c0_i32_1 = arith.constant 0 : i32
    return %c0_i32, %c0_i32_0 : i32, i32
  }
  func.func @transform_4(%arg0: i32, %arg1: i32) -> (i32, i32) {
    %c0_i32 = arith.constant 0 : i32
    %c0_i32_0 = arith.constant 0 : i32
    %c0_i32_1 = arith.constant 0 : i32
    return %c0_i32, %c0_i32_0 : i32, i32
  }
  func.func @transform_5(%arg0: i32, %arg1: i32) -> (i32, i32, i32) {
    %c0_i32 = arith.constant 0 : i32
    %c0_i32_0 = arith.constant 0 : i32
    return %arg0, %c0_i32, %arg1 : i32, i32, i32
  }
  func.func @transform_6(%arg0: i32, %arg1: i32) -> (i32, i32, i32, i32) {
    %c0_i32 = arith.constant 0 : i32
    %c0_i32_0 = arith.constant 0 : i32
    %c0_i32_1 = arith.constant 0 : i32
    return %arg0, %arg1, %c0_i32, %c0_i32_0 : i32, i32, i32, i32
  }
}

module attributes {stable_mosaic.version = 11 : i64} {
  func.func @_bn_logit_kernel(%arg0: i32, %arg1: memref<2x8x128xf32, #tpu.memory_space<vmem>>, %arg2: memref<8x18xf32, #tpu.memory_space<vmem>>, %arg3: memref<1xf32, #tpu.memory_space<smem>>, %arg4: memref<2x8x128xf32, #tpu.memory_space<vmem>>, %arg5: memref<1x128xf32, #tpu.memory_space<vmem>>) attributes {dimension_semantics = [#tpu.dimension_semantics<parallel>], iteration_bounds = array<i64: 1>, scalar_prefetch = 0 : i64, scratch_operands = 0 : i64, tpu.core_type = #tpu.core_type<tc>, window_params = [{transform_indices = @transform_0, window_bounds = array<i64: 2, 8, 128>}, {pipeline_mode = #tpu.pipeline_mode<synchronous>, transform_indices = @transform_1, window_bounds = array<i64: 8, 18>}, {transform_indices = @transform_2, window_bounds = array<i64: 1>}, {transform_indices = @transform_3, window_bounds = array<i64: 2, 8, 128>}, {transform_indices = @transform_4, window_bounds = array<i64: 1, 128>}]} {
    %c0 = arith.constant 0 : index
    %c0_0 = arith.constant 0 : index
    %c0_1 = arith.constant 0 : index
    %0 = vector.load %arg1[%c0, %c0_0, %c0_1] : memref<2x8x128xf32, #tpu.memory_space<vmem>>, vector<1x8x128xf32>
    %1 = vector.shape_cast %0 : vector<1x8x128xf32> to vector<8x128xf32>
    %c1 = arith.constant 1 : index
    %c0_2 = arith.constant 0 : index
    %c0_3 = arith.constant 0 : index
    %2 = vector.load %arg1[%c1, %c0_2, %c0_3] : memref<2x8x128xf32, #tpu.memory_space<vmem>>, vector<1x8x128xf32>
    %3 = vector.shape_cast %2 : vector<1x8x128xf32> to vector<8x128xf32>
    %c0_4 = arith.constant 0 : index
    %c16 = arith.constant 16 : index
    %4 = vector.load %arg2[%c0_4, %c16] : memref<8x18xf32, #tpu.memory_space<vmem>>, vector<8x1xf32>
    %c0_5 = arith.constant 0 : index
    %c17 = arith.constant 17 : index
    %5 = vector.load %arg2[%c0_5, %c17] : memref<8x18xf32, #tpu.memory_space<vmem>>, vector<8x1xf32>
    %6 = vector.broadcast %4 : vector<8x1xf32> to vector<8x128xf32>
    %7 = arith.mulf %6, %1 : vector<8x128xf32>
    %8 = vector.broadcast %5 : vector<8x1xf32> to vector<8x128xf32>
    %9 = arith.addf %7, %8 : vector<8x128xf32>
    %10 = vector.broadcast %4 : vector<8x1xf32> to vector<8x128xf32>
    %11 = arith.mulf %10, %3 : vector<8x128xf32>
    %12 = vector.broadcast %5 : vector<8x1xf32> to vector<8x128xf32>
    %13 = arith.addf %11, %12 : vector<8x128xf32>
    %c0_6 = arith.constant 0 : index
    %c0_7 = arith.constant 0 : index
    %c0_8 = arith.constant 0 : index
    %14 = vector.load %arg4[%c0_6, %c0_7, %c0_8] : memref<2x8x128xf32, #tpu.memory_space<vmem>>, vector<1x8x128xf32>
    %15 = vector.shape_cast %14 : vector<1x8x128xf32> to vector<8x128xf32>
    %16 = vector.shape_cast %9 : vector<8x128xf32> to vector<1x8x128xf32>
    tpu.vector_store %arg4[%c0_6, %c0_7, %c0_8], %16 {strides = array<i32>} : memref<2x8x128xf32, #tpu.memory_space<vmem>>, vector<1x8x128xf32>,
    %c1_9 = arith.constant 1 : index
    %c0_10 = arith.constant 0 : index
    %c0_11 = arith.constant 0 : index
    %17 = vector.load %arg4[%c1_9, %c0_10, %c0_11] : memref<2x8x128xf32, #tpu.memory_space<vmem>>, vector<1x8x128xf32>
    %18 = vector.shape_cast %17 : vector<1x8x128xf32> to vector<8x128xf32>
    %19 = vector.shape_cast %13 : vector<8x128xf32> to vector<1x8x128xf32>
    tpu.vector_store %arg4[%c1_9, %c0_10, %c0_11], %19 {strides = array<i32>} : memref<2x8x128xf32, #tpu.memory_space<vmem>>, vector<1x8x128xf32>,
    %c0_12 = arith.constant 0 : index
    %c4 = arith.constant 4 : index
    %20 = vector.load %arg2[%c0_12, %c4] : memref<8x18xf32, #tpu.memory_space<vmem>>, vector<8x1xf32>
    %21 = vector.broadcast %20 : vector<8x1xf32> to vector<8x128xf32>
    %22 = arith.subf %9, %21 : vector<8x128xf32>
    %c0_13 = arith.constant 0 : index
    %c5 = arith.constant 5 : index
    %23 = vector.load %arg2[%c0_13, %c5] : memref<8x18xf32, #tpu.memory_space<vmem>>, vector<8x1xf32>
    %24 = vector.broadcast %23 : vector<8x1xf32> to vector<8x128xf32>
    %25 = arith.subf %13, %24 : vector<8x128xf32>
    %c0_14 = arith.constant 0 : index
    %c0_15 = arith.constant 0 : index
    %26 = vector.load %arg2[%c0_14, %c0_15] : memref<8x18xf32, #tpu.memory_space<vmem>>, vector<8x1xf32>
    %27 = vector.broadcast %26 : vector<8x1xf32> to vector<8x128xf32>
    %28 = arith.mulf %27, %22 : vector<8x128xf32>
    %c0_16 = arith.constant 0 : index
    %c1_17 = arith.constant 1 : index
    %29 = vector.load %arg2[%c0_16, %c1_17] : memref<8x18xf32, #tpu.memory_space<vmem>>, vector<8x1xf32>
    %30 = vector.broadcast %29 : vector<8x1xf32> to vector<8x128xf32>
    %31 = arith.mulf %30, %22 : vector<8x128xf32>
    %32 = arith.maximumf %28, %31 : vector<8x128xf32>
    %c0_18 = arith.constant 0 : index
    %c2 = arith.constant 2 : index
    %33 = vector.load %arg2[%c0_18, %c2] : memref<8x18xf32, #tpu.memory_space<vmem>>, vector<8x1xf32>
    %34 = vector.broadcast %33 : vector<8x1xf32> to vector<8x128xf32>
    %35 = arith.mulf %34, %25 : vector<8x128xf32>
    %c0_19 = arith.constant 0 : index
    %c3 = arith.constant 3 : index
    %36 = vector.load %arg2[%c0_19, %c3] : memref<8x18xf32, #tpu.memory_space<vmem>>, vector<8x1xf32>
    %37 = vector.broadcast %36 : vector<8x1xf32> to vector<8x128xf32>
    %38 = arith.mulf %37, %25 : vector<8x128xf32>
    %39 = arith.maximumf %35, %38 : vector<8x128xf32>
    %c0_20 = arith.constant 0 : index
    %c6 = arith.constant 6 : index
    %40 = vector.load %arg2[%c0_20, %c6] : memref<8x18xf32, #tpu.memory_space<vmem>>, vector<8x1xf32>
    %c0_21 = arith.constant 0 : index
    %c10 = arith.constant 10 : index
    %41 = vector.load %arg2[%c0_21, %c10] : memref<8x18xf32, #tpu.memory_space<vmem>>, vector<8x1xf32>
    %42 = vector.broadcast %41 : vector<8x1xf32> to vector<8x128xf32>
    %43 = arith.subf %9, %42 : vector<8x128xf32>
    %44 = vector.broadcast %40 : vector<8x1xf32> to vector<8x128xf32>
    %45 = arith.mulf %44, %43 : vector<8x128xf32>
    %c0_22 = arith.constant 0 : index
    %c7 = arith.constant 7 : index
    %46 = vector.load %arg2[%c0_22, %c7] : memref<8x18xf32, #tpu.memory_space<vmem>>, vector<8x1xf32>
    %c0_23 = arith.constant 0 : index
    %c11 = arith.constant 11 : index
    %47 = vector.load %arg2[%c0_23, %c11] : memref<8x18xf32, #tpu.memory_space<vmem>>, vector<8x1xf32>
    %48 = vector.broadcast %47 : vector<8x1xf32> to vector<8x128xf32>
    %49 = arith.subf %9, %48 : vector<8x128xf32>
    %50 = vector.broadcast %46 : vector<8x1xf32> to vector<8x128xf32>
    %51 = arith.mulf %50, %49 : vector<8x128xf32>
    %52 = arith.maximumf %45, %51 : vector<8x128xf32>
    %c0_24 = arith.constant 0 : index
    %c8 = arith.constant 8 : index
    %53 = vector.load %arg2[%c0_24, %c8] : memref<8x18xf32, #tpu.memory_space<vmem>>, vector<8x1xf32>
    %c0_25 = arith.constant 0 : index
    %c12 = arith.constant 12 : index
    %54 = vector.load %arg2[%c0_25, %c12] : memref<8x18xf32, #tpu.memory_space<vmem>>, vector<8x1xf32>
    %55 = vector.broadcast %54 : vector<8x1xf32> to vector<8x128xf32>
    %56 = arith.subf %13, %55 : vector<8x128xf32>
    %57 = vector.broadcast %53 : vector<8x1xf32> to vector<8x128xf32>
    %58 = arith.mulf %57, %56 : vector<8x128xf32>
    %c0_26 = arith.constant 0 : index
    %c9 = arith.constant 9 : index
    %59 = vector.load %arg2[%c0_26, %c9] : memref<8x18xf32, #tpu.memory_space<vmem>>, vector<8x1xf32>
    %c0_27 = arith.constant 0 : index
    %c13 = arith.constant 13 : index
    %60 = vector.load %arg2[%c0_27, %c13] : memref<8x18xf32, #tpu.memory_space<vmem>>, vector<8x1xf32>
    %61 = vector.broadcast %60 : vector<8x1xf32> to vector<8x128xf32>
    %62 = arith.subf %13, %61 : vector<8x128xf32>
    %63 = vector.broadcast %59 : vector<8x1xf32> to vector<8x128xf32>
    %64 = arith.mulf %63, %62 : vector<8x128xf32>
    %65 = arith.maximumf %58, %64 : vector<8x128xf32>
    %c0_28 = arith.constant 0 : index
    %c14 = arith.constant 14 : index
    %66 = vector.load %arg2[%c0_28, %c14] : memref<8x18xf32, #tpu.memory_space<vmem>>, vector<8x1xf32>
    %67 = vector.broadcast %66 : vector<8x1xf32> to vector<8x128xf32>
    %68 = arith.mulf %67, %52 : vector<8x128xf32>
    %69 = arith.mulf %68, %52 : vector<8x128xf32>
    %c0_29 = arith.constant 0 : index
    %c15 = arith.constant 15 : index
    %70 = vector.load %arg2[%c0_29, %c15] : memref<8x18xf32, #tpu.memory_space<vmem>>, vector<8x1xf32>
    %71 = vector.broadcast %70 : vector<8x1xf32> to vector<8x128xf32>
    %72 = arith.mulf %71, %65 : vector<8x128xf32>
    %73 = arith.mulf %72, %65 : vector<8x128xf32>
    %74 = arith.addf %69, %73 : vector<8x128xf32>
    %75 = arith.mulf %32, %39 : vector<8x128xf32>
    %76 = arith.subf %74, %75 : vector<8x128xf32>
    %cst = arith.constant dense<0.000000e+00> : vector<128xf32>
    %77 = vector.multi_reduction <add>, %76, %cst [0] : vector<8x128xf32> to vector<128xf32>
    %78 = vector.shape_cast %77 : vector<128xf32> to vector<1x128xf32>
    %c0_30 = arith.constant 0 : index
    %79 = memref.load %arg3[%c0_30] : memref<1xf32, #tpu.memory_space<smem>>
    %80 = vector.broadcast %79 : f32 to vector<1x128xf32>
    %81 = arith.addf %78, %80 : vector<1x128xf32>
    %c0_31 = arith.constant 0 : index
    %c0_32 = arith.constant 0 : index
    %82 = vector.load %arg5[%c0_31, %c0_32] : memref<1x128xf32, #tpu.memory_space<vmem>>, vector<1x128xf32>
    tpu.vector_store %arg5[%c0_31, %c0_32], %81 {strides = array<i32>} : memref<1x128xf32, #tpu.memory_space<vmem>>, vector<1x128xf32>,
    return
  }
  func.func @transform_0(%arg0: i32) -> (i32, i32, i32) {
    %c0_i32 = arith.constant 0 : i32
    %c0_i32_0 = arith.constant 0 : i32
    %c0_i32_1 = arith.constant 0 : i32
    return %c0_i32, %c0_i32_0, %arg0 : i32, i32, i32
  }
  func.func @transform_1(%arg0: i32) -> (i32, i32) {
    %c0_i32 = arith.constant 0 : i32
    %c0_i32_0 = arith.constant 0 : i32
    %c0_i32_1 = arith.constant 0 : i32
    return %c0_i32, %c0_i32_0 : i32, i32
  }
  func.func @transform_2(%arg0: i32) -> i32 {
    %c0_i32 = arith.constant 0 : i32
    %c0_i32_0 = arith.constant 0 : i32
    return %c0_i32 : i32
  }
  func.func @transform_3(%arg0: i32) -> (i32, i32, i32) {
    %c0_i32 = arith.constant 0 : i32
    %c0_i32_0 = arith.constant 0 : i32
    %c0_i32_1 = arith.constant 0 : i32
    return %c0_i32, %c0_i32_0, %arg0 : i32, i32, i32
  }
  func.func @transform_4(%arg0: i32) -> (i32, i32) {
    %c0_i32 = arith.constant 0 : i32
    %c0_i32_0 = arith.constant 0 : i32
    return %c0_i32, %arg0 : i32, i32
  }
}

</mosaic_0001>

<bundles_post_ra>
// kernel: net_forward.3
= control target key start
LH: loop header
LB: loop body
LE: loop exit
PB: predicated region body
PF: predicated region fallthrough
CT: control target
= control target key end

     0   :  { %v185_v0 = vmov 0   ;;  %v186_v1 = vmov 4   ;;  %v187_v3 = vmov 16   ;;  %v188_v4 = vmov 1   ;;  %s249_s1 = inlined_call_operand.vmem [shape: f32[8,18], index: 1, kind: input, shape index: {}]   ;;  %s250_s0 = inlined_call_operand.vmem [shape: f32[2,8,128], index: 0, kind: input, shape index: {}]   ;;  %s251_s3 = inlined_call_operand.vmem [shape: f32[2,8,128], index: 3, kind: output, shape index: {0}]   ;;  %s252_s2 = inlined_call_operand.<no memory space> [shape: f32[1], index: 2, kind: input, shape index: {}]   ;;  %s253_s4 = inlined_call_operand.vmem [shape: f32[1,128], index: 4, kind: output, shape index: {1}]  }
   0x1   :  { %170 = vset.pattern.permute.xlu2 %v185_v0  ;;  %168 = vset.pattern.permute.xlu1 %v186_v1  ;;  %v37_v2 = vld [vmem:[%s249_s1] sm:$0xff]  ;;  %v189_v5 = vmov 5   ;;  %v190_v6 = vmov 17   ;;  %v191_v7 = vmov 10   ;;  %v192_v8 = vmov 2   ;;  %v146_v24 = vld [vmem:[%s250_s0 + $0x8] sm:$0xff] }
   0x2   :  { %166 = vset.pattern.permute.xlu0 %v187_v3  ;;  %50 = vperm.xlu2 %170, %v37_v2   ;;  %v193_v9 = vmov 11   ;;  %v194_v10 = vmov 13   ;;  %v195_v11 = vmov 12   ;;  %v196_v12 = vmov 8   ;;  %v17_v23 = vld [vmem:[%s250_s0] sm:$0xff] }
   0x3   :  { %40 = vperm.xlu1 %168, %v37_v2   ;;  %23 = vperm.xlu0 %166, %v37_v2   ;;  %v197_v13 = vmov 7   ;;  %v198_v14 = vmov 6   ;;  %v199_v15 = vmov 15   ;;  %v200_v16 = vmov 3  }
   0x4   :  { %v201_v17 = vmov 9   ;;  %v202_v18 = vmov 14  }
   0xa   :  { %171 = vset.pattern.permute.xlu2 %v188_v4 }
   0xb   :  { %169 = vset.pattern.permute.xlu1 %v189_v5  ;;  %167 = vset.pattern.permute.xlu0 %v190_v6 }
   0xc   :  { %55 = vperm.xlu2 %171, %v37_v2   ;;  %45 = vperm.xlu1 %169, %v37_v2  }
   0xd   :  { %28 = vperm.xlu0 %167, %v37_v2  }
  0x14   :  { %173 = vset.pattern.permute.xlu2 %v191_v7  ;;  %172 = vset.pattern.permute.xlu1 %v192_v8 }
  0x15   :  { %72 = vperm.xlu2 %173, %v37_v2   ;;  %61 = vperm.xlu1 %172, %v37_v2  }
  0x16   :  { %174 = vset.pattern.permute.xlu0 %v193_v9  ;;  %v135_v9 = vstv %s252_s2 }
  0x17   :  { %82 = vperm.xlu0 %174, %v37_v2  }
  0x1d   :  { %176 = vset.pattern.permute.xlu2 %v194_v10  ;;  %175 = vset.pattern.permute.xlu1 %v195_v11 }
  0x1e   :  { %103 = vperm.xlu2 %176, %v37_v2   ;;  %93 = vperm.xlu1 %175, %v37_v2  }
  0x1f   :  { %179 = vset.pattern.permute.xlu0 %v196_v12 }
  0x20   :  { %98 = vperm.xlu0 %179, %v37_v2  }
  0x26   :  { %178 = vset.pattern.permute.xlu2 %v197_v13  ;;  %177 = vset.pattern.permute.xlu1 %v198_v14 }
  0x27   :  { %87 = vperm.xlu2 %178, %v37_v2   ;;  %77 = vperm.xlu1 %177, %v37_v2  }
  0x28   :  { %184 = vset.pattern.permute.xlu0 %v199_v15 }
  0x2f   :  { %181 = vset.pattern.permute.xlu2 %v200_v16  ;;  %180 = vset.pattern.permute.xlu1 %v201_v17 }
  0x30   :  { %66 = vperm.xlu2 %181, %v37_v2   ;;  %108 = vperm.xlu1 %180, %v37_v2  }
  0x38   :  { %182 = vset.pattern.permute.xlu1 %v202_v18  ;;  %183 = vset.pattern.permute.xlu2 %v199_v15 }
  0x39   :  { %114 = vperm.xlu1 %182, %v37_v2   ;;  %120 = vperm.xlu2 %183, %v37_v2  }
  0x5c   :  { %v51_v19 = vpop.permute.xlu2 %50 }
  0x66   :  { %v56_v22 = vpop.permute.xlu2 %55 }
  0x6f   :  { %v73_v30 = vpop.permute.xlu2 %72 }
  0x75   :  { %v41_v20 = vpop.permute.xlu1 %40  ;;  %v24_v21 = vpop.permute.xlu0 %23 }
  0x76   :  { %v26_v25 = vmul.f32 %v24_v21, %v17_v23  ;;  %v32_v26 = vmul.f32 %v146_v24, %v24_v21 }
  0x78   :  { %v104_v33 = vpop.permute.xlu2 %103 }
  0x7e   :  { %v46_v27 = vpop.permute.xlu1 %45 }
  0x7f   :  { %v29_v28 = vpop.permute.xlu0 %28 }
  0x80   :  { %v31_v29 = vadd.f32 %v29_v28, %v26_v25  ;;  %v33_v31 = vadd.f32 %v32_v26, %v29_v28 }
  0x81   :  { %v88_v35 = vpop.permute.xlu2 %87 }
  0x82   :  { %34 = vst [vmem:[%s251_s3] sm:$0xff] %v31_v29  ;;  %v106_v41 = vsub.f32 %v33_v31, %v104_v33  ;;  %v75_v46 = vsub.f32 %v31_v29, %v73_v30  ;;  %v43_v47 = vsub.f32 %v31_v29, %v41_v20  ;;  %v48_v48 = vsub.f32 %v33_v31, %v46_v27 }
  0x83   :  { %147 = vst [vmem:[%s251_s3 + $0x8] sm:$0xff] %v33_v31 }
  0x84   :  { %v53_v54 = vmul.f32 %v51_v19, %v43_v47  ;;  %v58_v56 = vmul.f32 %v56_v22, %v43_v47 }
  0x86   :  { %v59_v62 = vmax.f32 %v53_v54, %v58_v56 }
  0x87   :  { %v62_v32 = vpop.permute.xlu1 %61 }
  0x88   :  { %v64_v55 = vmul.f32 %v62_v32, %v48_v48 }
  0x89   :  { %v83_v36 = vpop.permute.xlu0 %82 }
  0x8a   :  { %v67_v38 = vpop.permute.xlu2 %66  ;;  %v85_v44 = vsub.f32 %v31_v29, %v83_v36 }
  0x8b   :  { %v69_v52 = vmul.f32 %v67_v38, %v48_v48 }
  0x8c   :  { %v90_v53 = vmul.f32 %v88_v35, %v85_v44 }
  0x8d   :  { %v70_v60 = vmax.f32 %v64_v55, %v69_v52 }
  0x8f   :  { %v126_v1 = vmul.f32 %v70_v60, %v59_v62 }
  0x90   :  { %v94_v34 = vpop.permute.xlu1 %93 }
  0x91   :  { %v96_v39 = vsub.f32 %v33_v31, %v94_v34 }
  0x92   :  { %v99_v40 = vpop.permute.xlu0 %98 }
  0x93   :  { %v101_v45 = vmul.f32 %v99_v40, %v96_v39  ;;  %v121_v51 = vpop.permute.xlu2 %120 }
  0x99   :  { %v78_v37 = vpop.permute.xlu1 %77 }
  0x9a   :  { %v80_v49 = vmul.f32 %v78_v37, %v75_v46 }
  0x9c   :  { %v91_v58 = vmax.f32 %v80_v49, %v90_v53 }
  0xa2   :  { %v109_v42 = vpop.permute.xlu1 %108 }
  0xa3   :  { %v111_v43 = vmul.f32 %v109_v42, %v106_v41 }
  0xa5   :  { %v112_v50 = vmax.f32 %v101_v45, %v111_v43 }
  0xa7   :  { %v123_v57 = vmul.f32 %v121_v51, %v112_v50 }
  0xa9   :  { %v124_v63 = vmul.f32 %v123_v57, %v112_v50 }
  0xab   :  { %v115_v59 = vpop.permute.xlu1 %114 }
  0xac   :  { %v117_v61 = vmul.f32 %v115_v59, %v91_v58 }
  0xae   :  { %v118_v0 = vmul.f32 %v117_v61, %v91_v58 }
  0xb0   :  { %v125_v2 = vadd.f32 %v124_v63, %v118_v0 }
  0xb2   :  { %v127_v3 = vsub.f32 %v125_v2, %v126_v1 }
  0xb4   :  { %v128_v4 = vrot.slane %v127_v3, 4 }
  0xb6   :  { %v129_v5 = vadd.f32 %v128_v4, %v127_v3 }
  0xb8   :  { %v130_v6 = vrot.slane %v129_v5, 2 }
  0xba   :  { %v131_v7 = vadd.f32 %v130_v6, %v129_v5 }
  0xbc   :  { %v132_v8 = vrot.slane %v131_v7, 1 }
  0xbe   :  { %v133_v10 = vadd.f32 %v132_v8, %v131_v7 }
  0xc0   :  { %v136_v11 = vadd.f32 %v135_v9, %v133_v10 }
  0xc2   :  { %137 = vst [vmem:[%s253_s4] sm:$0x1] %v136_v11 }

// kernel: net_forward.2
= control target key start
LH: loop header
LB: loop body
LE: loop exit
PB: predicated region body
PF: predicated region fallthrough
CT: control target
= control target key end

     0   :  { %s661_s21 = smov 0   ;;  %s663_s22 = smov 0   ;;  %s732_s0 = inlined_call_operand.vmem [shape: f32[2,12,128], index: 0, kind: input, shape index: {}]   ;;  %s733_s1 = inlined_call_operand.vmem [shape: f32[32,12], index: 1, kind: input, shape index: {}]   ;;  %s734_s2 = inlined_call_operand.vmem [shape: f32[32,1], index: 2, kind: input, shape index: {}]   ;;  %s735_s3 = inlined_call_operand.vmem [shape: f32[8,16], index: 3, kind: input, shape index: {}]   ;;  %s736_s4 = inlined_call_operand.vmem [shape: f32[8,1], index: 4, kind: input, shape index: {}]   ;;  %s737_s5 = inlined_call_operand.vmem [shape: f32[2,8,128], index: 5, kind: output, shape index: {0}]   ;;  %s738_s6 = inlined_call_operand.vmem [shape: f32[2,1,1,16], index: 6, kind: output, shape index: {1}]  }
   0x1   :  { %s665_s23 = smov 0  }
   0x2 LB: > { %s29_s24 = sadd.s32 1, %s618_s22  ;;  %p555_p0 = scmp.ge.s32.totalorder %s622_s23, 1  ;;  %s622_s23 = sphi %s665_s23, %s17_s23   ;;  %s618_s22 = sphi %s663_s22, %s740_s22   ;;  %s614_s21 = sphi %s661_s21, %s739_s21  }
   0x3   : > { %p31_p1 = scmp.ge.s32.totalorder %s29_s24, 2  ;;  %p236_p2 = scmp.lt.s32.totalorder %s622_s23, 3 }
   0x5   : > { %s742_s24 = smov (%p31_p1, %s29_s24), 0  ;;  %p237_p3 = pnand %p555_p0, %p236_p2 }
   0x6   : > { %p277_p4 = scmp.lt.s32.totalorder (!%p237_p3), %s614_s21, 1 }
   0x7   : > { %240 = sbr.rel (%p237_p3) target bundleno = 435 (0x1b3), region = 40 }
   0xc   : > { %v624_v0 = vmov 0   ;;  %v305_v1 = vld [vmem:[%s734_s2 + $0x8] sm:$0xff]  ;;  %s744_s21 = smov (!%p277_p4, %s614_s21), 1  ;;  %v304_v2 = vld [vmem:[%s734_s2] sm:$0xff]  ;;  %vm341_vm0 = vcmask 1043456   ;;  %vm328_vm1 = vcmask 97280   ;;  %v410_v27 = vlaneseq }
   0xd   : > { %598 = vset.pattern.permute.xlu1 %v624_v0  ;;  %597 = vset.pattern.permute.xlu0 %v624_v0  ;;  %s568_s29 = sshll.u32 %s744_s21, 4  ;;  %v300_v5 = vld [vmem:[%s733_s1] sm:$0xff]  ;;  %v302_v6 = vld [vmem:[%s733_s1 + $0x10] sm:$0xff]  ;;  %v307_v7 = vld [vmem:[%s734_s2 + $0x18] sm:$0xff]  ;;  %vm377_vm2 = vcmask 130048   ;;  %v625_v34 = vmov 1.0   ;;  %s297_s11 = scalar_lea.vmem %s738_s6, %s744_s21 }
   0xe   : > { %315 = vperm.xlu0 %597, %v305_v1   ;;  %599 = vset.pattern.permute.xlu2 %v624_v0  ;;  %s284_s8 = scalar_lea.vmem %s732_s0, %s568_s29  ;;  %v306_v8 = vld [vmem:[%s734_s2 + $0x10] sm:$0xff]  ;;  %v301_v9 = vld [vmem:[%s733_s1 + $0x8] sm:$0xff]  ;;  %v303_v10 = vld [vmem:[%s733_s1 + $0x18] sm:$0xff]  ;;  %v411_v28 = vand.u32 127, %v410_v27  ;;  %s558_s29 = sshll.u32 %s744_s21, 3  ;;  %vm437_vm4 = vcmask 122880  }
   0xf   : > { %310 = vperm.xlu1 %598, %v304_v2   ;;  %v299_v3 = vld [vmem:[%s284_s8 + $0x8] sm:$0xf]  ;;  %v298_v4 = vld [vmem:[%s284_s8] sm:$0xff]  ;;  %s291_s8 = scalar_lea.vmem %s737_s5, %s558_s29 }
  0x10   : > { %559 = vmatpush.msk.msra.mxu0 %vm341_vm0, %v299_v3  ;;  %569 = vmatpush.msk.msra.mxu3 %vm341_vm0, %v299_v3  ;;  %v401_v11 = vld [vmem:[%s736_s4] sm:$0xff]  ;;  %vm414_vm3 = vcmp.lt.s32.totalorder %v411_v28, 8 }
  0x11   : > { %404 = vperm.xlu2 %599, %v401_v11   ;;  %v376_v26 = vld [vmem:[%s735_s3] sm:$0xff] }
  0x12   : > { %360 = vmatpush.msra.mxu0 %v298_v4  ;;  %570 = vmatpush.msra.mxu3 %v298_v4 }
  0x13   : > { %560 = vmatmul.msk.f32.vlgmr.msra.gmra.mxu0 %vm328_vm1, %v300_v5  ;;  %562 = vmatmul.msk.f32.vlgmr.msra.gmra.mxu3 %vm328_vm1, %v302_v6 }
  0x16   : > { %325 = vperm.xlu0 %597, %v307_v7  }
  0x17   : > { %320 = vperm.xlu1 %598, %v306_v8  }
  0x1b   : > { %561 = vmatmul.msk.f32.gmra.mxu0 %vm328_vm1, %v301_v9  ;;  %563 = vmatmul.msk.f32.gmra.mxu3 %vm328_vm1, %v303_v10 }
  0x6b   : > { %v405_v29 = vpop.permute.xlu2 %404 }
  0x80   : > { %v316_v14 = vpop.permute.xlu0 %315 }
  0x81   : > { %v311_v12 = vpop.permute.xlu1 %310 }
  0x88   : > { %v326_v18 = vpop.permute.xlu0 %325 }
  0x89   : > { %v321_v16 = vpop.permute.xlu1 %320 }
  0x90   : > { %v362_v13 = vpop.f32.mrf.mxu0 }
  0x91   : > { %v363_v20 = vadd.f32 %v362_v13, %v311_v12 }
  0x96   : > { %v368_v15 = vpop.f32.mrf.mxu3 }
  0x97   : > { %v369_v21 = vadd.f32 %v368_v15, %v321_v16 }
  0x98   : > { %v365_v17 = vpop.f32.mrf.mxu0 }
  0x99   : > { %v366_v22 = vadd.f32 %v365_v17, %v316_v14  ;;  %v374_v25 = vmax.f32 %v363_v20, %v369_v21 }
  0x9e   : > { %v371_v19 = vpop.f32.mrf.mxu3 }
  0x9f   : > { %v372_v23 = vadd.f32 %v371_v19, %v326_v18 }
  0xa1   : > { %v375_v24 = vmax.f32 %v366_v22, %v372_v23 }
  0xa3   : > { %395 = vmatpush.msra.mxu1 %v375_v24 }
  0xa5   : > { %396 = vmatpush.msra.mxu1 %v374_v25 }
  0xa6   : > { %564 = vmatmul.msk.f32.vlgmr.msra.gmra.mxu1 %vm377_vm2, %v376_v26 }
 0x123   : > { %v398_v30 = vpop.f32.mrf.mxu1 }
 0x124   : > { %v407_v31 = vadd.f32 %v405_v29, %v398_v30  ;;  %v415_v32 = vsel %vm414_vm3, %v398_v30, 0.0 }
 0x125   : > { %v416_v33 = vmul.f32 %v415_v32, %v415_v32 }
 0x126   : > { %408 = vst [vmem:[%s291_s8] sm:$0xff] %v407_v31 }
 0x127   : > { %431 = vmatpush.xpose.msra.mxu2 %v416_v33 }
 0x12b   : > { %565 = vmatpush.xpose.msk.msra.mxu2 %vm414_vm3, %v398_v30 }
 0x12e   : > { %433 = vmatmul.f32.vlgmr.msra.gmra.mxu2 %v625_v34 }
 0x1b1   : > { %v434_v35 = vpop.f32.mrf.mxu2 }
 0x1b2   : > { %438 = vst.msk [vmem:[%s297_s11] sm:$0x1] %vm437_vm4, %v434_v35 }
 0x1b3 PF: > { %s17_s23 = sadd.s32 1, %s622_s23   ;;  %s739_s21 = smov %s618_s22 }
 0x1b4   : > { %p14_p5 = scmp.ge.s32.totalorder %s17_s23, 4   ;;  %s740_s22 = smov %s742_s24 }
 0x1b6   :  { %16 = sbr.rel (!%p14_p5) target bundleno = 2 (0x2), region = 82 }

</bundles_post_ra>
